<compile_context>
chip_gen: v7x
topology: tpu7x:2x2x1
jax: 0.10.0
libtpu: 0.0.40
codegen_flags: <defaults>
</compile_context>

<pallas_src>
import functools

import jax
import jax.numpy as jnp
from jax.experimental import pallas as pl
from jax.experimental.pallas import tpu as pltpu

EPS = 1e-12  # matches torch LayerNorm(..., eps=1e-12)


def _round_up(a, b):
    return ((a + b - 1) // b) * b


def _relu_layernorm_cols(z):
    """ReLU then LayerNorm over the feature axis (axis 0) of (features, rows).

    Single-pass stats; no affine (gamma/beta are folded into the next layer).
    """
    h = jnp.maximum(z, 0.0)
    mu = jnp.mean(h, axis=0, keepdims=True)
    ex2 = jnp.mean(h * h, axis=0, keepdims=True)
    var = jnp.maximum(ex2 - mu * mu, 0.0)      # clamp: guard fp cancellation
    return (h - mu) * jax.lax.rsqrt(var + EPS)


def mlp_kernel(x_ref, w1_ref, w2_ref, w3_ref, w4_ref,
               b1_ref, b2_ref, b3_ref, b4_ref, o_ref):
    x = x_ref[...]                              # (adim, tm): rows on lanes
    w1 = w1_ref[...]
    if x.dtype != w1.dtype:                     # cast only when needed
        x = x.astype(w1.dtype)

    # Layer 1: (d1, adim) @ (adim, tm) -> (d1, tm); f32 accumulate.
    h = jnp.dot(w1, x, preferred_element_type=jnp.float32)
    h = _relu_layernorm_cols(h + b1_ref[...])

    # Layer 2 (gamma1/beta1 already folded into w2/b2).
    h = jnp.dot(w2_ref[...], h.astype(w2_ref.dtype),
                preferred_element_type=jnp.float32)
    h = _relu_layernorm_cols(h + b2_ref[...])

    # Layer 3 (gamma2/beta2 folded).
    h = jnp.dot(w3_ref[...], h.astype(w3_ref.dtype),
                preferred_element_type=jnp.float32)
    h = _relu_layernorm_cols(h + b3_ref[...])

    # Layer 4 (gamma3/beta3 folded; no activation / norm). Lane-dense store.
    out = jnp.dot(w4_ref[...], h.astype(w4_ref.dtype),
                  preferred_element_type=jnp.float32)
    o_ref[...] = (out + b4_ref[...]).astype(o_ref.dtype)


def _choose_row_tile(N, adim, itemsize, row_tile):
    """Largest 128-aligned tile under a VMEM budget, with >= 2 grid steps."""
    d1 = max(adim // 2, 8)
    # Per-row VMEM cost: double-buffered input column + double-buffered output
    # column + generous headroom for f32 intermediates.
    bytes_per_row = 2 * adim * itemsize + 2 * 2 * 4 + 6 * d1 * 4
    vmem_budget = 24 << 20                       # conservative for v7x (64 MiB)
    tm_vmem = max(128, ((vmem_budget // bytes_per_row) // 128) * 128)
    # Keep at least 2 grid steps when there is enough data (v7x: 2 TensorCores
    # share the 'parallel' row axis).
    tm_two_steps = max(128, _round_up(-(-N // 2), 128))
    return max(128, min(_round_up(row_tile, 128), tm_vmem, tm_two_steps))


@functools.partial(jax.jit, static_argnames=("row_tile",))
def net_forward(x, params, row_tile=8192):
    """x: (B, T, adim). params from fold_params(). Returns (B, T, 2) float32."""
    B, T, adim = x.shape
    N = B * T
    w1, w2, w3, w4, b1, b2, b3, b4 = params

    itemsize = jnp.dtype(x.dtype).itemsize
    tm = _choose_row_tile(N, adim, itemsize, row_tile)
    n_pad = _round_up(N, tm)
    grid = (n_pad // tm,)

    # Lane-dense presentation: (adim, N_pad) with N on the lane axis.
    # TODO(synk): in a real pipeline, fuse this transpose into the producer op.
    xT = x.reshape(N, adim).T
    if n_pad != N:
        xT = jnp.pad(xT, ((0, 0), (0, n_pad - N)))

    def cols_map(i):
        return (0, i)

    def const_map(i):
        return (0, 0)

    def whole(p):                                # resident param: full block
        return pl.BlockSpec(p.shape, const_map)

    out = pl.pallas_call(
        mlp_kernel,
        out_shape=jax.ShapeDtypeStruct((2, n_pad), jnp.float32),
        grid=grid,
        in_specs=[
            pl.BlockSpec((adim, tm), cols_map),
            whole(w1), whole(w2), whole(w3), whole(w4),
            whole(b1), whole(b2), whole(b3), whole(b4),
        ],
        out_specs=pl.BlockSpec((2, tm), cols_map),
        compiler_params=pltpu.CompilerParams(
            dimension_semantics=("parallel",),
            vmem_limit_bytes=40 * 1024 * 1024),
    )(xT, w1, w2, w3, w4, b1, b2, b3, b4)

    # (2, n_pad) -> (B, T, 2).  Keep the :N slice (padded columns are finite
    # garbage).  This tiny transpose is layout plumbing; fuse into the
    # consumer / keep the (2, N) layout downstream when possible.
    return out[:, :N].T.reshape(B, T, 2)


def init_raw_params(key, adim):
    """Raw torch-layout parameters: Linear weights (out,in), biases, LN affine."""
    d1, d2, d3, d4 = adim // 2, adim // 4, adim // 8, 2
    ks = jax.random.split(key, 14)

    def lin(kw, kb, din, dout):
        bound = 1.0 / jnp.sqrt(din)
        w = jax.random.uniform(kw, (dout, din), jnp.float32, -bound, bound)
        b = jax.random.uniform(kb, (dout,), jnp.float32, -bound, bound)
        return w, b

    w1, b1 = lin(ks[0], ks[1], adim, d1)
    w2, b2 = lin(ks[2], ks[3], d1, d2)
    w3, b3 = lin(ks[4], ks[5], d2, d3)
    w4, b4 = lin(ks[6], ks[7], d3, d4)
    # torch initializes gamma=1, beta=0; use non-trivial values here so the
    # gamma/beta folding path is genuinely exercised by the correctness check.
    g1 = 1.0 + 0.1 * jax.random.normal(ks[8], (d1,), jnp.float32)
    g2 = 1.0 + 0.1 * jax.random.normal(ks[9], (d2,), jnp.float32)
    g3 = 1.0 + 0.1 * jax.random.normal(ks[10], (d3,), jnp.float32)
    be1 = 0.1 * jax.random.normal(ks[11], (d1,), jnp.float32)
    be2 = 0.1 * jax.random.normal(ks[12], (d2,), jnp.float32)
    be3 = 0.1 * jax.random.normal(ks[13], (d3,), jnp.float32)
    return (w1, b1, w2, b2, w3, b3, w4, b4, g1, be1, g2, be2, g3, be3)


def fold_params(raw, dtype=jnp.float32):
    """Fold LayerNorm gamma/beta into the next layer; pack for the kernel.

    Weights are optionally cast to bf16 (recommended on v5e/v6e/v7x); biases
    stay f32 as (d, 1) columns for the rows-on-lanes layout.
    """
    (w1, b1, w2, b2, w3, b3, w4, b4, g1, be1, g2, be2, g3, be3) = raw
    w2f = w2 * g1[None, :]
    b2f = b2 + w2 @ be1
    w3f = w3 * g2[None, :]
    b3f = b3 + w3 @ be2
    w4f = w4 * g3[None, :]
    b4f = b4 + w4 @ be3
    ws = tuple(w.astype(dtype) for w in (w1, w2f, w3f, w4f))
    bs = tuple(b.reshape(-1, 1).astype(jnp.float32)
               for b in (b1, b2f, b3f, b4f))
    return ws + bs          # (w1, w2, w3, w4, b1, b2, b3, b4)


def reference_forward(x, raw, matmul_dtype=jnp.float32):
    """Pure-JAX reference with torch semantics on the *unfused* parameters."""
    (w1, b1, w2, b2, w3, b3, w4, b4, g1, be1, g2, be2, g3, be3) = raw
    B, T, adim = x.shape
    h = x.reshape(-1, adim).astype(jnp.float32)

    def lin(h, w, b):
        return jnp.dot(h.astype(matmul_dtype), w.T.astype(matmul_dtype),
                       preferred_element_type=jnp.float32) + b

    def ln(h, g, be):
        mu = jnp.mean(h, -1, keepdims=True)
        var = jnp.mean((h - mu) ** 2, -1, keepdims=True)
        return (h - mu) * jax.lax.rsqrt(var + EPS) * g + be

    h = ln(jnp.maximum(lin(h, w1, b1), 0.0), g1, be1)
    h = ln(jnp.maximum(lin(h, w2, b2), 0.0), g2, be2)
    h = ln(jnp.maximum(lin(h, w3, b3), 0.0), g3, be3)
    out = lin(h, w4, b4)
    return out.reshape(B, T, 2)


if __name__ == "__main__":
    key = jax.random.PRNGKey(0)
    k_x, k_p = jax.random.split(key)

    B, T, ADIM = 2, 8, 32
    x = jax.random.normal(k_x, (B, T, ADIM), jnp.float32)
    raw = init_raw_params(k_p, ADIM)

    # float32 path.
    params_f32 = fold_params(raw, dtype=jnp.float32)
    out = jax.block_until_ready(net_forward(x, params_f32))
    ref = reference_forward(x, raw, matmul_dtype=jnp.float32)
    assert out.shape == (B, T, 2)
    assert jnp.allclose(out, ref, atol=1e-4, rtol=1e-4), \
        "f32 mismatch vs pure-JAX reference"

    # bf16 matmul path (recommended on all generations: kernel is HBM-bound;
    # LayerNorm math stays float32 inside the kernel).
    params_bf16 = fold_params(raw, dtype=jnp.bfloat16)
    out_bf16 = jax.block_until_ready(
        net_forward(x.astype(jnp.bfloat16), params_bf16))
    ref_bf16 = reference_forward(x, raw, matmul_dtype=jnp.bfloat16)
    assert jnp.allclose(out_bf16, ref_bf16, atol=3e-2, rtol=3e-2), \
        "bf16 mismatch vs pure-JAX reference"

    print("KERNEL_OK")
</pallas_src>

<mosaic_0001>
module attributes {stable_mosaic.version = 11 : i64} {
  func.func @mlp_kernel(%arg0: i32, %arg1: memref<32x128xf32, #tpu.memory_space<vmem>>, %arg2: memref<16x32xf32, #tpu.memory_space<vmem>>, %arg3: memref<8x16xf32, #tpu.memory_space<vmem>>, %arg4: memref<4x8xf32, #tpu.memory_space<vmem>>, %arg5: memref<2x4xf32, #tpu.memory_space<vmem>>, %arg6: memref<16x1xf32, #tpu.memory_space<vmem>>, %arg7: memref<8x1xf32, #tpu.memory_space<vmem>>, %arg8: memref<4x1xf32, #tpu.memory_space<vmem>>, %arg9: memref<2x1xf32, #tpu.memory_space<vmem>>, %arg10: memref<2x128xf32, #tpu.memory_space<vmem>>) attributes {dimension_semantics = [#tpu.dimension_semantics<parallel>], iteration_bounds = array<i64: 1>, scalar_prefetch = 0 : i64, scratch_operands = 0 : i64, tpu.core_type = #tpu.core_type<tc>, window_params = [{transform_indices = @transform_0, window_bounds = array<i64: 32, 128>}, {pipeline_mode = #tpu.pipeline_mode<synchronous>, transform_indices = @transform_1, window_bounds = array<i64: 16, 32>}, {pipeline_mode = #tpu.pipeline_mode<synchronous>, transform_indices = @transform_2, window_bounds = array<i64: 8, 16>}, {pipeline_mode = #tpu.pipeline_mode<synchronous>, transform_indices = @transform_3, window_bounds = array<i64: 4, 8>}, {pipeline_mode = #tpu.pipeline_mode<synchronous>, transform_indices = @transform_4, window_bounds = array<i64: 2, 4>}, {pipeline_mode = #tpu.pipeline_mode<synchronous>, transform_indices = @transform_5, window_bounds = array<i64: 16, 1>}, {pipeline_mode = #tpu.pipeline_mode<synchronous>, transform_indices = @transform_6, window_bounds = array<i64: 8, 1>}, {pipeline_mode = #tpu.pipeline_mode<synchronous>, transform_indices = @transform_7, window_bounds = array<i64: 4, 1>}, {pipeline_mode = #tpu.pipeline_mode<synchronous>, transform_indices = @transform_8, window_bounds = array<i64: 2, 1>}, {transform_indices = @transform_9, window_bounds = array<i64: 2, 128>}]} {
    %c0 = arith.constant 0 : index
    %c0_0 = arith.constant 0 : index
    %0 = vector.load %arg1[%c0, %c0_0] : memref<32x128xf32, #tpu.memory_space<vmem>>, vector<32x128xf32>
    %c0_1 = arith.constant 0 : index
    %c0_2 = arith.constant 0 : index
    %1 = vector.load %arg2[%c0_1, %c0_2] : memref<16x32xf32, #tpu.memory_space<vmem>>, vector<16x32xf32>
    %cst = arith.constant dense<0.000000e+00> : vector<16x128xf32>
    %2 = tpu.matmul %1, %0, %cst {dimension_numbers = #tpu.dot_dimension_numbers<[1], [0], [0], [1], [0, 0, 1, 1], [], []>} : vector<16x32xf32>, vector<32x128xf32>, vector<16x128xf32> -> vector<16x128xf32>
    %c0_3 = arith.constant 0 : index
    %c0_4 = arith.constant 0 : index
    %3 = vector.load %arg6[%c0_3, %c0_4] : memref<16x1xf32, #tpu.memory_space<vmem>>, vector<16x1xf32>
    %4 = vector.broadcast %3 : vector<16x1xf32> to vector<16x128xf32>
    %5 = arith.addf %2, %4 : vector<16x128xf32>
    %cst_5 = arith.constant 0.000000e+00 : f32
    %6 = vector.broadcast %cst_5 : f32 to vector<16x128xf32>
    %7 = arith.maximumf %5, %6 : vector<16x128xf32>
    %cst_6 = arith.constant dense<0.000000e+00> : vector<128xf32>
    %8 = vector.multi_reduction <add>, %7, %cst_6 [0] : vector<16x128xf32> to vector<128xf32>
    %9 = vector.shape_cast %8 : vector<128xf32> to vector<1x128xf32>
    %cst_7 = arith.constant 1.600000e+01 : f32
    %10 = vector.broadcast %cst_7 : f32 to vector<1x128xf32>
    %11 = arith.divf %9, %10 : vector<1x128xf32>
    %12 = arith.mulf %7, %7 : vector<16x128xf32>
    %cst_8 = arith.constant dense<0.000000e+00> : vector<128xf32>
    %13 = vector.multi_reduction <add>, %12, %cst_8 [0] : vector<16x128xf32> to vector<128xf32>
    %14 = vector.shape_cast %13 : vector<128xf32> to vector<1x128xf32>
    %cst_9 = arith.constant 1.600000e+01 : f32
    %15 = vector.broadcast %cst_9 : f32 to vector<1x128xf32>
    %16 = arith.divf %14, %15 : vector<1x128xf32>
    %17 = arith.mulf %11, %11 : vector<1x128xf32>
    %18 = arith.subf %16, %17 : vector<1x128xf32>
    %cst_10 = arith.constant 0.000000e+00 : f32
    %19 = vector.broadcast %cst_10 : f32 to vector<1x128xf32>
    %20 = arith.maximumf %18, %19 : vector<1x128xf32>
    %21 = vector.broadcast %11 : vector<1x128xf32> to vector<16x128xf32>
    %22 = arith.subf %7, %21 : vector<16x128xf32>
    %cst_11 = arith.constant 9.99999996E-13 : f32
    %23 = vector.broadcast %cst_11 : f32 to vector<1x128xf32>
    %24 = arith.addf %20, %23 : vector<1x128xf32>
    %25 = math.rsqrt %24 : vector<1x128xf32>
    %26 = vector.broadcast %25 : vector<1x128xf32> to vector<16x128xf32>
    %27 = arith.mulf %22, %26 : vector<16x128xf32>
    %c0_12 = arith.constant 0 : index
    %c0_13 = arith.constant 0 : index
    %28 = vector.load %arg3[%c0_12, %c0_13] : memref<8x16xf32, #tpu.memory_space<vmem>>, vector<8x16xf32>
    %cst_14 = arith.constant dense<0.000000e+00> : vector<8x128xf32>
    %29 = tpu.matmul %28, %27, %cst_14 {dimension_numbers = #tpu.dot_dimension_numbers<[1], [0], [0], [1], [0, 0, 1, 1], [], []>} : vector<8x16xf32>, vector<16x128xf32>, vector<8x128xf32> -> vector<8x128xf32>
    %c0_15 = arith.constant 0 : index
    %c0_16 = arith.constant 0 : index
    %30 = vector.load %arg7[%c0_15, %c0_16] : memref<8x1xf32, #tpu.memory_space<vmem>>, vector<8x1xf32>
    %31 = vector.broadcast %30 : vector<8x1xf32> to vector<8x128xf32>
    %32 = arith.addf %29, %31 : vector<8x128xf32>
    %cst_17 = arith.constant 0.000000e+00 : f32
    %33 = vector.broadcast %cst_17 : f32 to vector<8x128xf32>
    %34 = arith.maximumf %32, %33 : vector<8x128xf32>
    %cst_18 = arith.constant dense<0.000000e+00> : vector<128xf32>
    %35 = vector.multi_reduction <add>, %34, %cst_18 [0] : vector<8x128xf32> to vector<128xf32>
    %36 = vector.shape_cast %35 : vector<128xf32> to vector<1x128xf32>
    %cst_19 = arith.constant 8.000000e+00 : f32
    %37 = vector.broadcast %cst_19 : f32 to vector<1x128xf32>
    %38 = arith.divf %36, %37 : vector<1x128xf32>
    %39 = arith.mulf %34, %34 : vector<8x128xf32>
    %cst_20 = arith.constant dense<0.000000e+00> : vector<128xf32>
    %40 = vector.multi_reduction <add>, %39, %cst_20 [0] : vector<8x128xf32> to vector<128xf32>
    %41 = vector.shape_cast %40 : vector<128xf32> to vector<1x128xf32>
    %cst_21 = arith.constant 8.000000e+00 : f32
    %42 = vector.broadcast %cst_21 : f32 to vector<1x128xf32>
    %43 = arith.divf %41, %42 : vector<1x128xf32>
    %44 = arith.mulf %38, %38 : vector<1x128xf32>
    %45 = arith.subf %43, %44 : vector<1x128xf32>
    %cst_22 = arith.constant 0.000000e+00 : f32
    %46 = vector.broadcast %cst_22 : f32 to vector<1x128xf32>
    %47 = arith.maximumf %45, %46 : vector<1x128xf32>
    %48 = vector.broadcast %38 : vector<1x128xf32> to vector<8x128xf32>
    %49 = arith.subf %34, %48 : vector<8x128xf32>
    %cst_23 = arith.constant 9.99999996E-13 : f32
    %50 = vector.broadcast %cst_23 : f32 to vector<1x128xf32>
    %51 = arith.addf %47, %50 : vector<1x128xf32>
    %52 = math.rsqrt %51 : vector<1x128xf32>
    %53 = vector.broadcast %52 : vector<1x128xf32> to vector<8x128xf32>
    %54 = arith.mulf %49, %53 : vector<8x128xf32>
    %c0_24 = arith.constant 0 : index
    %c0_25 = arith.constant 0 : index
    %55 = vector.load %arg4[%c0_24, %c0_25] : memref<4x8xf32, #tpu.memory_space<vmem>>, vector<4x8xf32>
    %cst_26 = arith.constant dense<0.000000e+00> : vector<4x128xf32>
    %56 = tpu.matmul %55, %54, %cst_26 {dimension_numbers = #tpu.dot_dimension_numbers<[1], [0], [0], [1], [0, 0, 1, 1], [], []>} : vector<4x8xf32>, vector<8x128xf32>, vector<4x128xf32> -> vector<4x128xf32>
    %c0_27 = arith.constant 0 : index
    %c0_28 = arith.constant 0 : index
    %57 = vector.load %arg8[%c0_27, %c0_28] : memref<4x1xf32, #tpu.memory_space<vmem>>, vector<4x1xf32>
    %58 = vector.broadcast %57 : vector<4x1xf32> to vector<4x128xf32>
    %59 = arith.addf %56, %58 : vector<4x128xf32>
    %cst_29 = arith.constant 0.000000e+00 : f32
    %60 = vector.broadcast %cst_29 : f32 to vector<4x128xf32>
    %61 = arith.maximumf %59, %60 : vector<4x128xf32>
    %cst_30 = arith.constant dense<0.000000e+00> : vector<128xf32>
    %62 = vector.multi_reduction <add>, %61, %cst_30 [0] : vector<4x128xf32> to vector<128xf32>
    %63 = vector.shape_cast %62 : vector<128xf32> to vector<1x128xf32>
    %cst_31 = arith.constant 4.000000e+00 : f32
    %64 = vector.broadcast %cst_31 : f32 to vector<1x128xf32>
    %65 = arith.divf %63, %64 : vector<1x128xf32>
    %66 = arith.mulf %61, %61 : vector<4x128xf32>
    %cst_32 = arith.constant dense<0.000000e+00> : vector<128xf32>
    %67 = vector.multi_reduction <add>, %66, %cst_32 [0] : vector<4x128xf32> to vector<128xf32>
    %68 = vector.shape_cast %67 : vector<128xf32> to vector<1x128xf32>
    %cst_33 = arith.constant 4.000000e+00 : f32
    %69 = vector.broadcast %cst_33 : f32 to vector<1x128xf32>
    %70 = arith.divf %68, %69 : vector<1x128xf32>
    %71 = arith.mulf %65, %65 : vector<1x128xf32>
    %72 = arith.subf %70, %71 : vector<1x128xf32>
    %cst_34 = arith.constant 0.000000e+00 : f32
    %73 = vector.broadcast %cst_34 : f32 to vector<1x128xf32>
    %74 = arith.maximumf %72, %73 : vector<1x128xf32>
    %75 = vector.broadcast %65 : vector<1x128xf32> to vector<4x128xf32>
    %76 = arith.subf %61, %75 : vector<4x128xf32>
    %cst_35 = arith.constant 9.99999996E-13 : f32
    %77 = vector.broadcast %cst_35 : f32 to vector<1x128xf32>
    %78 = arith.addf %74, %77 : vector<1x128xf32>
    %79 = math.rsqrt %78 : vector<1x128xf32>
    %80 = vector.broadcast %79 : vector<1x128xf32> to vector<4x128xf32>
    %81 = arith.mulf %76, %80 : vector<4x128xf32>
    %c0_36 = arith.constant 0 : index
    %c0_37 = arith.constant 0 : index
    %82 = vector.load %arg5[%c0_36, %c0_37] : memref<2x4xf32, #tpu.memory_space<vmem>>, vector<2x4xf32>
    %cst_38 = arith.constant dense<0.000000e+00> : vector<2x128xf32>
    %83 = tpu.matmul %82, %81, %cst_38 {dimension_numbers = #tpu.dot_dimension_numbers<[1], [0], [0], [1], [0, 0, 1, 1], [], []>} : vector<2x4xf32>, vector<4x128xf32>, vector<2x128xf32> -> vector<2x128xf32>
    %c0_39 = arith.constant 0 : index
    %c0_40 = arith.constant 0 : index
    %84 = vector.load %arg9[%c0_39, %c0_40] : memref<2x1xf32, #tpu.memory_space<vmem>>, vector<2x1xf32>
    %85 = vector.broadcast %84 : vector<2x1xf32> to vector<2x128xf32>
    %86 = arith.addf %83, %85 : vector<2x128xf32>
    %c0_41 = arith.constant 0 : index
    %c0_42 = arith.constant 0 : index
    %87 = vector.load %arg10[%c0_41, %c0_42] : memref<2x128xf32, #tpu.memory_space<vmem>>, vector<2x128xf32>
    tpu.vector_store %arg10[%c0_41, %c0_42], %86 {strides = array<i32>} : memref<2x128xf32, #tpu.memory_space<vmem>>, vector<2x128xf32>,
    return
  }
  func.func @transform_0(%arg0: i32) -> (i32, i32) {
    %c0_i32 = arith.constant 0 : i32
    %c0_i32_0 = arith.constant 0 : i32
    return %c0_i32, %arg0 : i32, i32
  }
  func.func @transform_1(%arg0: i32) -> (i32, i32) {
    %c0_i32 = arith.constant 0 : i32
    %c0_i32_0 = arith.constant 0 : i32
    %c0_i32_1 = arith.constant 0 : i32
    return %c0_i32, %c0_i32_0 : i32, i32
  }
  func.func @transform_2(%arg0: i32) -> (i32, i32) {
    %c0_i32 = arith.constant 0 : i32
    %c0_i32_0 = arith.constant 0 : i32
    %c0_i32_1 = arith.constant 0 : i32
    return %c0_i32, %c0_i32_0 : i32, i32
  }
  func.func @transform_3(%arg0: i32) -> (i32, i32) {
    %c0_i32 = arith.constant 0 : i32
    %c0_i32_0 = arith.constant 0 : i32
    %c0_i32_1 = arith.constant 0 : i32
    return %c0_i32, %c0_i32_0 : i32, i32
  }
  func.func @transform_4(%arg0: i32) -> (i32, i32) {
    %c0_i32 = arith.constant 0 : i32
    %c0_i32_0 = arith.constant 0 : i32
    %c0_i32_1 = arith.constant 0 : i32
    return %c0_i32, %c0_i32_0 : i32, i32
  }
  func.func @transform_5(%arg0: i32) -> (i32, i32) {
    %c0_i32 = arith.constant 0 : i32
    %c0_i32_0 = arith.constant 0 : i32
    %c0_i32_1 = arith.constant 0 : i32
    return %c0_i32, %c0_i32_0 : i32, i32
  }
  func.func @transform_6(%arg0: i32) -> (i32, i32) {
    %c0_i32 = arith.constant 0 : i32
    %c0_i32_0 = arith.constant 0 : i32
    %c0_i32_1 = arith.constant 0 : i32
    return %c0_i32, %c0_i32_0 : i32, i32
  }
  func.func @transform_7(%arg0: i32) -> (i32, i32) {
    %c0_i32 = arith.constant 0 : i32
    %c0_i32_0 = arith.constant 0 : i32
    %c0_i32_1 = arith.constant 0 : i32
    return %c0_i32, %c0_i32_0 : i32, i32
  }
  func.func @transform_8(%arg0: i32) -> (i32, i32) {
    %c0_i32 = arith.constant 0 : i32
    %c0_i32_0 = arith.constant 0 : i32
    %c0_i32_1 = arith.constant 0 : i32
    return %c0_i32, %c0_i32_0 : i32, i32
  }
  func.func @transform_9(%arg0: i32) -> (i32, i32) {
    %c0_i32 = arith.constant 0 : i32
    %c0_i32_0 = arith.constant 0 : i32
    return %c0_i32, %arg0 : i32, i32
  }
}

</mosaic_0001>

<bundles_post_ra>
// kernel: net_forward.1
= control target key start
LH: loop header
LB: loop body
LE: loop exit
PB: predicated region body
PF: predicated region fallthrough
CT: control target
= control target key end

     0   :  { %vm50_vm0 = vcmask 261120   ;;  %v534_v3 = vmov 0   ;;  %v535_v12 = vmov 0.0|0.0   ;;  %vm536_vm1 = vmmov 0   ;;  %s641_s0 = inlined_call_operand.vmem [shape: f32[32,128], index: 0, kind: input, shape index: {}]   ;;  %s642_s1 = inlined_call_operand.vmem [shape: f32[16,32], index: 1, kind: input, shape index: {}]   ;;  %s643_s5 = inlined_call_operand.vmem [shape: f32[16,1], index: 5, kind: input, shape index: {}]   ;;  %s644_s8 = inlined_call_operand.vmem [shape: f32[2,1], index: 8, kind: input, shape index: {}]   ;;  %s645_s6 = inlined_call_operand.vmem [shape: f32[8,1], index: 6, kind: input, shape index: {}]   ;;  %s646_s7 = inlined_call_operand.vmem [shape: f32[4,1], index: 7, kind: input, shape index: {}]   ;;  %s647_s2 = inlined_call_operand.vmem [shape: f32[8,16], index: 2, kind: input, shape index: {}]   ;;  %s648_s3 = inlined_call_operand.vmem [shape: f32[4,8], index: 3, kind: input, shape index: {}]   ;;  %s649_s4 = inlined_call_operand.vmem [shape: f32[2,4], index: 4, kind: input, shape index: {}]   ;;  %s650_s9 = inlined_call_operand.vmem [shape: f32[2,128], index: 9, kind: output, shape index: {}]  }
   0x1   :  { %v32_v0 = vld [vmem:[%s641_s0] sm:$0xff]  ;;  %v33_v1 = vld [vmem:[%s641_s0 + $0x8] sm:$0xff]  ;;  %v34_v2 = vld [vmem:[%s641_s0 + $0x10] sm:$0xff]  ;;  %526 = vset.pattern.permute.xlu0 %v534_v3  ;;  %527 = vset.pattern.permute.xlu1 %v534_v3  ;;  %v537_v13 = vmov 0.0   ;;  %vm169_vm2 = vcmask 130048   ;;  %vm274_vm3 = vcmask 64512  }
   0x2   :  { %v511_v4 = vpack.c.bf16 %v33_v1, %v32_v0  ;;  %v35_v5 = vld [vmem:[%s641_s0 + $0x18] sm:$0xff]  ;;  %v36_v6 = vld [vmem:[%s642_s1] sm:$0xff]  ;;  %v39_v9 = vld [vmem:[%s643_s5 + $0x8] sm:$0xff]  ;;  %519 = vmatprep.subr.bf16.mxu1 %v535_v12  ;;  %498 = vmatprep.mubr.msk.f32.mxu1 %vm536_vm1, %v537_v13  ;;  %vm349_vm4 = vcmask 1043456   ;;  %vm382_vm5 = vcmask 31744  }
   0x3   :  { %v515_v7 = vpack.c.bf16 %v35_v5, %v34_v2  ;;  %491 = vmatprep.mubr.msk.f32.mxu0 %vm50_vm0, %v36_v6  ;;  %v38_v8 = vld [vmem:[%s643_s5] sm:$0xff]  ;;  %v37_v10 = vld [vmem:[%s642_s1 + $0x8] sm:$0xff] }
   0x4   :  { %512 = vmatprep.subr.bf16.mxu0 %v511_v4  ;;  %42 = vperm.xlu0 %526, %v38_v8   ;;  %v376_v11 = vld [vmem:[%s644_s8] sm:$0x3] }
   0x5   :  { %514 = vmatpush3.bf16.msra.mxu0 %v511_v4  ;;  %v163_v14 = vld [vmem:[%s645_s6] sm:$0xff] }
   0x6   :  { %516 = vmatprep.subr.bf16.mxu0 %v515_v7  ;;  %166 = vperm.xlu1 %527, %v163_v14   ;;  %v268_v15 = vld [vmem:[%s646_s7] sm:$0xf] }
   0x7   :  { %v162_v52 = vld [vmem:[%s647_s2] sm:$0xff] }
   0x8   :  { %47 = vperm.xlu0 %526, %v39_v9  }
   0x9   :  { %518 = vmatpush3.bf16.msra.mxu0 %v515_v7 }
   0xa   :  { %506 = vmatprep.subr.mxu0 %v537_v13  ;;  %271 = vperm.xlu1 %527, %v268_v15  }
   0xc   :  { %492 = vmatmul.mubr.msk.f32.vlgmr.msra.gmra.mrb[0].mxu0 %vm50_vm0, %v37_v10  ;;  %379 = vperm.xlu0 %526, %v376_v11  }
   0xd   :  { %508 = vmatprep.mubr.msk.f32.mxu0 %vm536_vm1, %v537_v13 }
  0x83   :  { %v43_v16 = vpop.permute.xlu0 %42 }
  0x85   :  { %v167_v53 = vpop.permute.xlu1 %166 }
  0x87   :  { %v48_v17 = vpop.permute.xlu0 %47 }
  0xdf   :  { %v493_v18 = vpop.f32.mrb[0].mxu0 }
  0xe0   :  { %v129_v19 = vadd.f32 %v493_v18, %v48_v17  ;;  %v123_v20 = vpop.f32.mrb[1].mxu0  ;;  %v272_v17 = vpop.permute.xlu1 %271 }
  0xe1   :  { %v124_v21 = vadd.f32 %v123_v20, %v43_v16  ;;  %v267_v16 = vld [vmem:[%s648_s3] sm:$0xf] }
  0xe2   :  { %v133_v22 = vmax.f32 %v129_v19, 0.0 }
  0xe3   :  { %v132_v23 = vmax.f32 %v124_v21, 0.0 }
  0xe4   :  { %v144_v24 = vmul.f32 %v133_v22, %v133_v22 }
  0xe5   :  { %v134_v25 = vadd.f32 %v133_v22, %v132_v23  ;;  %v143_v26 = vmul.f32 %v132_v23, %v132_v23 }
  0xe7   :  { %v135_v27 = vrot.slane %v134_v25, 4  ;;  %v145_v28 = vadd.f32 %v144_v24, %v143_v26 }
  0xe9   :  { %v136_v29 = vadd.f32 %v135_v27, %v134_v25  ;;  %v146_v30 = vrot.slane %v145_v28, 4 }
  0xeb   :  { %v137_v31 = vrot.slane %v136_v29, 2  ;;  %v147_v32 = vadd.f32 %v146_v30, %v145_v28 }
  0xed   :  { %v138_v33 = vadd.f32 %v137_v31, %v136_v29  ;;  %v148_v34 = vrot.slane %v147_v32, 2 }
  0xef   :  { %v139_v35 = vrot.slane %v138_v33, 1  ;;  %v149_v36 = vadd.f32 %v148_v34, %v147_v32 }
  0xf1   :  { %v150_v37 = vrot.slane %v149_v36, 1  ;;  %v140_v38 = vadd.f32 %v139_v35, %v138_v33 }
  0xf3   :  { %v151_v39 = vadd.f32 %v150_v37, %v149_v36  ;;  %v142_v40 = vmul.f32 0.0625, %v140_v38 }
  0xf5   :  { %v152_v41 = vmul.f32 0.0625, %v151_v39  ;;  %v153_v42 = vmul.f32 %v142_v40, %v142_v40  ;;  %v156_v43 = vsub.f32 %v132_v23, %v142_v40  ;;  %v157_v44 = vsub.f32 %v133_v22, %v142_v40 }
  0xf7   :  { %v154_v45 = vsub.f32 %v152_v41, %v153_v42 }
  0xf9   :  { %v155_v46 = vmax.f32 %v154_v45, 0.0 }
  0xfb   :  { %v158_v47 = vadd.f32 1e-12, %v155_v46  ;;  %v375_v46 = vld [vmem:[%s649_s4] sm:$0x3] }
  0xfd   :  { %528 = vrsqrt.f32 %v158_v47  ;;  %v380_v47 = vpop.permute.xlu0 %379 }
 0x107   :  { %v529_v48 = vpop.eup %528 }
 0x108   :  { %v160_v49 = vmul.f32 %v529_v48, %v156_v43  ;;  %v161_v50 = vmul.f32 %v529_v48, %v157_v44 }
 0x10a   :  { %v520_v51 = vpack.c.bf16 %v161_v50, %v160_v49 }
 0x10c   :  { %521 = vmatpush3.bf16.msra.mxu1 %v520_v51 }
 0x10d   :  { %501 = vmatprep.subr.mxu1 %v537_v13 }
 0x10f   :  { %499 = vmatmul.mubr.msk.f32.vlgmr.msra.gmra.mrb[0].mxu1 %vm169_vm2, %v162_v52 }
 0x110   :  { %503 = vmatprep.mubr.msk.f32.mxu1 %vm536_vm1, %v537_v13 }
 0x1e2   :  { %v239_v54 = vpop.f32.mrb[0].mxu1 }
 0x1e3   :  { %v240_v55 = vadd.f32 %v239_v54, %v167_v53  ;;  %v500_v56 = vpop.f32.mrb[1].mxu1 }
 0x1e5   :  { %v243_v57 = vmax.f32 %v240_v55, 0.0 }
 0x1e7   :  { %v244_v58 = vrot.slane %v243_v57, 4  ;;  %v252_v59 = vmul.f32 %v243_v57, %v243_v57 }
 0x1e9   :  { %v245_v60 = vadd.f32 %v244_v58, %v243_v57  ;;  %v253_v61 = vrot.slane %v252_v59, 4 }
 0x1eb   :  { %v246_v62 = vrot.slane %v245_v60, 2  ;;  %v254_v63 = vadd.f32 %v253_v61, %v252_v59 }
 0x1ed   :  { %v247_v0 = vadd.f32 %v246_v62, %v245_v60  ;;  %v255_v1 = vrot.slane %v254_v63, 2 }
 0x1ef   :  { %v248_v2 = vrot.slane %v247_v0, 1  ;;  %v256_v3 = vadd.f32 %v255_v1, %v254_v63 }
 0x1f1   :  { %v249_v4 = vadd.f32 %v248_v2, %v247_v0  ;;  %v257_v5 = vrot.slane %v256_v3, 1 }
 0x1f3   :  { %v251_v6 = vmul.f32 0.125, %v249_v4  ;;  %v258_v7 = vadd.f32 %v257_v5, %v256_v3 }
 0x1f5   :  { %v259_v8 = vmul.f32 0.125, %v258_v7  ;;  %v260_v9 = vmul.f32 %v251_v6, %v251_v6  ;;  %v263_v13 = vsub.f32 %v243_v57, %v251_v6 }
 0x1f7   :  { %v261_v10 = vsub.f32 %v259_v8, %v260_v9 }
 0x1f9   :  { %v262_v11 = vmax.f32 %v261_v10, 0.0 }
 0x1fb   :  { %v264_v12 = vadd.f32 1e-12, %v262_v11 }
 0x1fd   :  { %530 = vrsqrt.f32 %v264_v12 }
 0x207   :  { %v531_v14 = vpop.eup %530 }
 0x208   :  { %v266_v15 = vmul.f32 %v531_v14, %v263_v13 }
 0x20a   :  { %502 = vmatpush3.msra.mxu1 %v266_v15 }
 0x20b   :  { %504 = vmatmul.mubr.msk.f32.vlgmr.msra.gmra.mrb[2].mxu1 %vm274_vm3, %v267_v16 }
 0x2de   :  { %v344_v18 = vpop.f32.mrb[2].mxu1 }
 0x2df   :  { %v345_v19 = vadd.f32 %v344_v18, %v272_v17  ;;  %v505_v20 = vpop.f32.mrb[3].mxu1 }
 0x2e1   :  { %v348_v21 = vmax.f32 %v345_v19, 0.0 }
 0x2e3   :  { %v350_v22 = vsel %vm349_vm4, %v348_v21, 0.0  ;;  %v359_v23 = vmul.f32 %v348_v21, %v348_v21 }
 0x2e4   :  { %v351_v24 = vrot.slane %v350_v22, 4 }
 0x2e5   :  { %v360_v25 = vsel %vm349_vm4, %v359_v23, 0.0 }
 0x2e6   :  { %v352_v26 = vadd.f32 %v351_v24, %v350_v22  ;;  %v361_v27 = vrot.slane %v360_v25, 4 }
 0x2e8   :  { %v353_v28 = vrot.slane %v352_v26, 2  ;;  %v362_v29 = vadd.f32 %v361_v27, %v360_v25 }
 0x2ea   :  { %v354_v30 = vadd.f32 %v353_v28, %v352_v26  ;;  %v363_v31 = vrot.slane %v362_v29, 2 }
 0x2ec   :  { %v355_v32 = vrot.slane %v354_v30, 1  ;;  %v364_v33 = vadd.f32 %v363_v31, %v362_v29 }
 0x2ee   :  { %v356_v34 = vadd.f32 %v355_v32, %v354_v30  ;;  %v365_v35 = vrot.slane %v364_v33, 1 }
 0x2f0   :  { %v358_v36 = vmul.f32 0.25, %v356_v34  ;;  %v366_v37 = vadd.f32 %v365_v35, %v364_v33 }
 0x2f2   :  { %v367_v38 = vmul.f32 0.25, %v366_v37  ;;  %v368_v39 = vmul.f32 %v358_v36, %v358_v36  ;;  %v371_v43 = vsub.f32 %v348_v21, %v358_v36 }
 0x2f4   :  { %v369_v40 = vsub.f32 %v367_v38, %v368_v39 }
 0x2f6   :  { %v370_v41 = vmax.f32 %v369_v40, 0.0 }
 0x2f8   :  { %v372_v42 = vadd.f32 1e-12, %v370_v41 }
 0x2fa   :  { %532 = vrsqrt.f32 %v372_v42 }
 0x304   :  { %v533_v44 = vpop.eup %532 }
 0x305   :  { %v374_v45 = vmul.f32 %v533_v44, %v371_v43 }
 0x307   :  { %507 = vmatpush3.msk.msra.mxu0 %vm349_vm4, %v374_v45 }
 0x308   :  { %509 = vmatmul.mubr.msk.f32.vlgmr.msra.gmra.mrb[2].mxu0 %vm382_vm5, %v375_v46 }
 0x3db   :  { %v455_v48 = vpop.f32.mrb[2].mxu0 }
 0x3dc   :  { %v456_v49 = vadd.f32 %v455_v48, %v380_v47  ;;  %v510_v50 = vpop.f32.mrb[3].mxu0 }
 0x3de   :  { %459 = vst [vmem:[%s650_s9] sm:$0x3] %v456_v49 }

</bundles_post_ra>
